<compile_context>
chip_gen: v7x
topology: tpu7x:2x2x1
jax: 0.10.0
libtpu: 0.0.40
codegen_flags: <defaults>
</compile_context>

<pallas_src>
import functools

import jax
import jax.numpy as jnp
import numpy as np
from jax import lax
from jax.experimental import pallas as pl
from jax.experimental.pallas import tpu as pltpu

EPS = 1e-5  # PyTorch BatchNorm default eps


def _round_up(x, m):
  return (x + m - 1) // m * m


def _choose_tb(n, length, batch_tile):
  """Batch-tile so TB*L is reasonably large but the grid keeps >= 2 steps."""
  rows_target = 1024
  tb = max(1, min(batch_tile, rows_target // max(length, 1)))
  tb = max(1, min(tb, n))
  if n >= 2:
    tb = min(tb, max(1, n // 2))   # >= 2 grid steps -> feeds both v7x TCs
  return tb


def _repblock_kernel(x_ref,
                     s1_ref, b1_ref,
                     w1_ref, cb1_ref,
                     w2_ref, cb2_ref,
                     o_ref,
                     *, K, L, Cp, Op, TB):
  """TB batch elements per grid step; each conv is one fused im2col matmul.

  BN2 / BN3 are already folded into (w1, cb1) / (w2, cb2) by the wrapper, so the
  body is: BN1 -> ReLU -> conv1' -> ReLU -> conv2' -> ReLU.
  """
  P = K // 2
  L1 = L + 2 * P - K + 1      # length after conv1 (== L for odd K)
  L2 = L1 + 2 * P - K + 1     # length after conv2

  # ---- BN1 -> ReLU (Dropout2d is identity in eval mode); f32 math, bf16 taps.
  x = x_ref[...].astype(jnp.float32)                              # (TB, L, Cp)
  a1 = jnp.maximum(x * s1_ref[...] + b1_ref[...], 0.0).astype(jnp.bfloat16)

  def conv_relu(a, l_in, l_out, w_ref, cb_ref, c_out):
    # Zero halo built in-register (no VMEM scratch roundtrip, no misaligned vst).
    if P > 0:
      zp = jnp.zeros((TB, P, Cp), jnp.bfloat16)
      ap = jnp.concatenate([zp, a, zp], axis=1)                   # (TB, l_in+2P, Cp)
    else:
      ap = a
    # im2col: K shifted taps fused along the lane axis -> single MXU matmul.
    cols = jnp.concatenate([ap[:, k:k + l_out, :] for k in range(K)], axis=-1)
    y = jnp.dot(cols.reshape(TB * l_out, K * Cp), w_ref[...],
                preferred_element_type=jnp.float32)               # (TB*l_out, c_out)
    y = y.reshape(TB, l_out, c_out) + cb_ref[...]
    return jnp.maximum(y, 0.0)

  # conv1 with BN2 folded in, then ReLU.
  a2 = conv_relu(a1, L, L1, w1_ref, cb1_ref, Cp).astype(jnp.bfloat16)
  # conv2 with BN3 folded in, then ReLU.
  out = conv_relu(a2, L1, L2, w2_ref, cb2_ref, Op)

  # Full lane-dense store; channel / length trims happen in the wrapper.
  o_ref[...] = out.astype(o_ref.dtype)


def repblock_forward_nlc(x_nlc, params, *, kernel_size, batch_tile=8,
                         out_dtype=jnp.bfloat16):
  """Channels-last entry point.  x_nlc: (N, L, C).  Returns (N, Lout, O)."""
  N, L, C = x_nlc.shape
  K = kernel_size
  P = K // 2
  O = params["conv2_w"].shape[0]
  L1 = L + 2 * P - K + 1
  L2 = L1 + 2 * P - K + 1
  Lout = L2 - 2

  Cp = _round_up(C, 128)
  Op = _round_up(O, 128)
  TB = _choose_tb(N, L, batch_tile)
  Np = _round_up(N, TB)

  # BatchNorm (eval) -> per-channel scale / bias:  y = x*s + b.
  def bn_scale_bias(g, b, m, v):
    s = g / jnp.sqrt(v + EPS)
    return s, b - m * s

  s1, b1 = bn_scale_bias(params["bn1_g"], params["bn1_b"],
                         params["bn1_m"], params["bn1_v"])
  s2, b2 = bn_scale_bias(params["bn2_g"], params["bn2_b"],
                         params["bn2_m"], params["bn2_v"])
  s3, b3 = bn_scale_bias(params["bn3_g"], params["bn3_b"],
                         params["bn3_m"], params["bn3_v"])

  def pad_row(v, n):
    return jnp.pad(v, (0, n - v.shape[0])).reshape(1, -1).astype(jnp.float32)

  s1p, b1p = pad_row(s1, Cp), pad_row(b1, Cp)

  # Fold BN2 into conv1 and BN3 into conv2 (scale output channels, fold bias).
  w1 = params["conv1_w"] * s2[:, None, None]            # (C, C, K)
  cb1 = params["conv1_b"] * s2 + b2                     # (C,)
  w2 = params["conv2_w"] * s3[:, None, None]            # (O, C, K)
  cb2 = params["conv2_b"] * s3 + b3                     # (O,)

  # PyTorch (out, in, K) -> (K, in, out) -> zero-pad channels -> (K*Cp, Cout), bf16.
  def im2col_weight(w, c_in, c_out, c_inp, c_outp):
    w = jnp.transpose(w, (2, 1, 0))
    w = jnp.pad(w, ((0, 0), (0, c_inp - c_in), (0, c_outp - c_out)))
    return w.reshape(K * c_inp, c_outp).astype(jnp.bfloat16)

  w1m = im2col_weight(w1, C, C, Cp, Cp)
  w2m = im2col_weight(w2, C, O, Cp, Op)
  cb1p, cb2p = pad_row(cb1, Cp), pad_row(cb2, Op)

  # bf16 input slab (halves HBM read bytes); zero-padded batch & channels.
  x_pad = jnp.pad(x_nlc.astype(jnp.bfloat16),
                  ((0, Np - N), (0, 0), (0, Cp - C)))

  kernel = functools.partial(_repblock_kernel, K=K, L=L, Cp=Cp, Op=Op, TB=TB)
  const = lambda shape: pl.BlockSpec(shape, lambda n: (0,) * len(shape))

  # Per-step VMEM budget: double-buffered I/O blocks, constants (assume 2 bufs),
  # in-register padded activations, im2col cols, f32 matmul outputs.
  out_bytes = np.dtype(out_dtype).itemsize
  est = (2 * TB * L * Cp * 2
         + 2 * TB * L2 * Op * out_bytes
         + 2 * (K * Cp * (Cp + Op) * 2 + (3 * Cp + Op) * 4)
         + TB * (L + 2 * P) * Cp * 2 + TB * (L1 + 2 * P) * Cp * 2
         + TB * L1 * K * Cp * 2 + TB * L2 * K * Cp * 2
         + TB * L1 * Cp * 4 + TB * L2 * Op * 4)
  # Cap at 56 MiB so the same tiling fits v7x's 64 MiB physical VMEM.
  vmem_limit = int(min(56 * 2**20, max(32 * 2**20, int(est * 1.5))))

  out_padded = pl.pallas_call(
      kernel,
      out_shape=jax.ShapeDtypeStruct((Np, L2, Op), out_dtype),
      grid_spec=pltpu.PrefetchScalarGridSpec(
          num_scalar_prefetch=0,
          grid=(Np // TB,),
          in_specs=[
              pl.BlockSpec((TB, L, Cp), lambda n: (n, 0, 0)),   # x (batch tile)
              const((1, Cp)), const((1, Cp)),                   # BN1 scale / bias
              const((K * Cp, Cp)), const((1, Cp)),              # conv1' (BN2 folded)
              const((K * Cp, Op)), const((1, Op)),              # conv2' (BN3 folded)
          ],
          out_specs=pl.BlockSpec((TB, L2, Op), lambda n: (n, 0, 0)),
      ),
      compiler_params=pltpu.CompilerParams(
          dimension_semantics=("parallel",),
          vmem_limit_bytes=vmem_limit),
  )(x_pad, s1p, b1p, w1m, cb1p, w2m, cb2p)

  # Strip batch / channel padding and apply the PyTorch [:, :, :-2] trim.
  return out_padded[:N, :Lout, :O]


def repblock_forward(x_ncl, params, *, kernel_size, batch_tile=8,
                     out_dtype=jnp.bfloat16):
  """PyTorch-layout wrapper.  x_ncl: (N, C, L).  Returns (N, O, Lout).

  Prefer `repblock_forward_nlc` in an NLC pipeline to avoid these two extra
  HBM transpose passes.
  """
  out_nlc = repblock_forward_nlc(jnp.transpose(x_ncl, (0, 2, 1)), params,
                                 kernel_size=kernel_size,
                                 batch_tile=batch_tile, out_dtype=out_dtype)
  return jnp.transpose(out_nlc, (0, 2, 1))


def repblock_reference(x, params, *, kernel_size):
  """Pure-JAX f32 reference (NCL layout) for correctness checking."""
  P = kernel_size // 2

  def bn(x, g, b, m, v):
    return (x - m[None, :, None]) / jnp.sqrt(v[None, :, None] + EPS) \
        * g[None, :, None] + b[None, :, None]

  def conv(x, w, b):
    y = lax.conv_general_dilated(x, w, window_strides=(1,), padding=[(P, P)],
                                 dimension_numbers=("NCH", "OIH", "NCH"))
    return y + b[None, :, None]

  a = jax.nn.relu(bn(x, params["bn1_g"], params["bn1_b"],
                     params["bn1_m"], params["bn1_v"]))
  y1 = conv(a, params["conv1_w"], params["conv1_b"])
  a2 = jax.nn.relu(bn(y1, params["bn2_g"], params["bn2_b"],
                      params["bn2_m"], params["bn2_v"]))
  y2 = conv(a2, params["conv2_w"], params["conv2_b"])
  out = jax.nn.relu(bn(y2, params["bn3_g"], params["bn3_b"],
                       params["bn3_m"], params["bn3_v"]))
  return out[:, :, :-2]


def make_params(key, in_channels, out_channels, kernel_size):
  ks = jax.random.split(key, 16)
  C, O, K = in_channels, out_channels, kernel_size
  u = lambda k, shape, lo=-0.5, hi=0.5: jax.random.uniform(k, shape, jnp.float32, lo, hi)
  return {
      "bn1_g": u(ks[0], (C,), 0.5, 1.5), "bn1_b": u(ks[1], (C,)),
      "bn1_m": u(ks[2], (C,)), "bn1_v": u(ks[3], (C,), 0.5, 1.5),
      "conv1_w": u(ks[4], (C, C, K)), "conv1_b": u(ks[5], (C,)),
      "bn2_g": u(ks[6], (C,), 0.5, 1.5), "bn2_b": u(ks[7], (C,)),
      "bn2_m": u(ks[8], (C,)), "bn2_v": u(ks[9], (C,), 0.5, 1.5),
      "conv2_w": u(ks[10], (O, C, K)), "conv2_b": u(ks[11], (O,)),
      "bn3_g": u(ks[12], (O,), 0.5, 1.5), "bn3_b": u(ks[13], (O,)),
      "bn3_m": u(ks[14], (O,)), "bn3_v": u(ks[15], (O,), 0.5, 1.5),
  }


if __name__ == "__main__":
  N, C, O, L, K = 2, 4, 8, 16, 3
  key = jax.random.PRNGKey(0)
  kx, kp = jax.random.split(key)
  x = jax.random.normal(kx, (N, C, L), jnp.float32)   # PyTorch NCL layout
  params = make_params(kp, C, O, K)

  out = repblock_forward(x, params, kernel_size=K)
  out = jax.block_until_ready(out)

  ref = repblock_reference(x, params, kernel_size=K)
  # bf16 I/O + bf16 MXU operands with f32 accumulation -> modest tolerance.
  out_f32 = np.asarray(out.astype(jnp.float32))
  np.testing.assert_allclose(out_f32, np.asarray(ref), rtol=5e-2, atol=5e-2)
  assert out.shape == (N, O, L - 2), out.shape
  print("KERNEL_OK")
</pallas_src>

<mosaic_0001>
module attributes {stable_mosaic.version = 11 : i64} {
  func.func @_repblock_kernel(%arg0: i32, %arg1: memref<1x16x128xbf16, #tpu.memory_space<vmem>>, %arg2: memref<1x128xf32, #tpu.memory_space<vmem>>, %arg3: memref<1x128xf32, #tpu.memory_space<vmem>>, %arg4: memref<384x128xbf16, #tpu.memory_space<vmem>>, %arg5: memref<1x128xf32, #tpu.memory_space<vmem>>, %arg6: memref<384x128xbf16, #tpu.memory_space<vmem>>, %arg7: memref<1x128xf32, #tpu.memory_space<vmem>>, %arg8: memref<1x16x128xbf16, #tpu.memory_space<vmem>>) attributes {dimension_semantics = [#tpu.dimension_semantics<parallel>], iteration_bounds = array<i64: 2>, scalar_prefetch = 0 : i64, scratch_operands = 0 : i64, tpu.core_type = #tpu.core_type<tc>, window_params = [{transform_indices = @transform_0, window_bounds = array<i64: 1, 16, 128>}, {pipeline_mode = #tpu.pipeline_mode<synchronous>, transform_indices = @transform_1, window_bounds = array<i64: 1, 128>}, {pipeline_mode = #tpu.pipeline_mode<synchronous>, transform_indices = @transform_2, window_bounds = array<i64: 1, 128>}, {pipeline_mode = #tpu.pipeline_mode<synchronous>, transform_indices = @transform_3, window_bounds = array<i64: 384, 128>}, {pipeline_mode = #tpu.pipeline_mode<synchronous>, transform_indices = @transform_4, window_bounds = array<i64: 1, 128>}, {pipeline_mode = #tpu.pipeline_mode<synchronous>, transform_indices = @transform_5, window_bounds = array<i64: 384, 128>}, {pipeline_mode = #tpu.pipeline_mode<synchronous>, transform_indices = @transform_6, window_bounds = array<i64: 1, 128>}, {transform_indices = @transform_7, window_bounds = array<i64: 1, 16, 128>}]} {
    %c0 = arith.constant 0 : index
    %c0_0 = arith.constant 0 : index
    %c0_1 = arith.constant 0 : index
    %0 = vector.load %arg1[%c0, %c0_0, %c0_1] : memref<1x16x128xbf16, #tpu.memory_space<vmem>>, vector<1x16x128xbf16>
    %1 = arith.extf %0 : vector<1x16x128xbf16> to vector<1x16x128xf32>
    %c0_2 = arith.constant 0 : index
    %c0_3 = arith.constant 0 : index
    %2 = vector.load %arg2[%c0_2, %c0_3] : memref<1x128xf32, #tpu.memory_space<vmem>>, vector<1x128xf32>
    %3 = vector.shape_cast %2 : vector<1x128xf32> to vector<1x1x128xf32>
    %4 = vector.broadcast %3 : vector<1x1x128xf32> to vector<1x16x128xf32>
    %5 = arith.mulf %1, %4 : vector<1x16x128xf32>
    %c0_4 = arith.constant 0 : index
    %c0_5 = arith.constant 0 : index
    %6 = vector.load %arg3[%c0_4, %c0_5] : memref<1x128xf32, #tpu.memory_space<vmem>>, vector<1x128xf32>
    %7 = vector.shape_cast %6 : vector<1x128xf32> to vector<1x1x128xf32>
    %8 = vector.broadcast %7 : vector<1x1x128xf32> to vector<1x16x128xf32>
    %9 = arith.addf %5, %8 : vector<1x16x128xf32>
    %cst = arith.constant 0.000000e+00 : f32
    %10 = vector.broadcast %cst : f32 to vector<1x16x128xf32>
    %11 = arith.maximumf %9, %10 : vector<1x16x128xf32>
    %12 = arith.truncf %11 : vector<1x16x128xf32> to vector<1x16x128xbf16>
    %cst_6 = arith.constant 0.000000e+00 : bf16
    %13 = vector.broadcast %cst_6 : bf16 to vector<1x1x128xbf16>
    %14 = tpu.concatenate %13, %12, %13 in 1 : vector<1x1x128xbf16>, vector<1x16x128xbf16>, vector<1x1x128xbf16> -> vector<1x18x128xbf16>
    %15 = vector.extract_strided_slice %14 {offsets = [0, 0, 0], sizes = [1, 16, 128], strides = [1, 1, 1]} : vector<1x18x128xbf16> to vector<1x16x128xbf16>
    %16 = vector.extract_strided_slice %14 {offsets = [0, 1, 0], sizes = [1, 16, 128], strides = [1, 1, 1]} : vector<1x18x128xbf16> to vector<1x16x128xbf16>
    %17 = vector.extract_strided_slice %14 {offsets = [0, 2, 0], sizes = [1, 16, 128], strides = [1, 1, 1]} : vector<1x18x128xbf16> to vector<1x16x128xbf16>
    %18 = tpu.concatenate %15, %16, %17 in 2 : vector<1x16x128xbf16>, vector<1x16x128xbf16>, vector<1x16x128xbf16> -> vector<1x16x384xbf16>
    %19 = vector.shape_cast %18 : vector<1x16x384xbf16> to vector<16x384xbf16>
    %c0_7 = arith.constant 0 : index
    %c0_8 = arith.constant 0 : index
    %20 = vector.load %arg4[%c0_7, %c0_8] : memref<384x128xbf16, #tpu.memory_space<vmem>>, vector<384x128xbf16>
    %cst_9 = arith.constant dense<0.000000e+00> : vector<16x128xf32>
    %21 = tpu.matmul %19, %20, %cst_9 {dimension_numbers = #tpu.dot_dimension_numbers<[1], [0], [0], [1], [0, 0, 1, 1], [], []>} : vector<16x384xbf16>, vector<384x128xbf16>, vector<16x128xf32> -> vector<16x128xf32>
    %22 = vector.shape_cast %21 : vector<16x128xf32> to vector<1x16x128xf32>
    %c0_10 = arith.constant 0 : index
    %c0_11 = arith.constant 0 : index
    %23 = vector.load %arg5[%c0_10, %c0_11] : memref<1x128xf32, #tpu.memory_space<vmem>>, vector<1x128xf32>
    %24 = vector.shape_cast %23 : vector<1x128xf32> to vector<1x1x128xf32>
    %25 = vector.broadcast %24 : vector<1x1x128xf32> to vector<1x16x128xf32>
    %26 = arith.addf %22, %25 : vector<1x16x128xf32>
    %cst_12 = arith.constant 0.000000e+00 : f32
    %27 = vector.broadcast %cst_12 : f32 to vector<1x16x128xf32>
    %28 = arith.maximumf %26, %27 : vector<1x16x128xf32>
    %29 = arith.truncf %28 : vector<1x16x128xf32> to vector<1x16x128xbf16>
    %cst_13 = arith.constant 0.000000e+00 : bf16
    %30 = vector.broadcast %cst_13 : bf16 to vector<1x1x128xbf16>
    %31 = tpu.concatenate %30, %29, %30 in 1 : vector<1x1x128xbf16>, vector<1x16x128xbf16>, vector<1x1x128xbf16> -> vector<1x18x128xbf16>
    %32 = vector.extract_strided_slice %31 {offsets = [0, 0, 0], sizes = [1, 16, 128], strides = [1, 1, 1]} : vector<1x18x128xbf16> to vector<1x16x128xbf16>
    %33 = vector.extract_strided_slice %31 {offsets = [0, 1, 0], sizes = [1, 16, 128], strides = [1, 1, 1]} : vector<1x18x128xbf16> to vector<1x16x128xbf16>
    %34 = vector.extract_strided_slice %31 {offsets = [0, 2, 0], sizes = [1, 16, 128], strides = [1, 1, 1]} : vector<1x18x128xbf16> to vector<1x16x128xbf16>
    %35 = tpu.concatenate %32, %33, %34 in 2 : vector<1x16x128xbf16>, vector<1x16x128xbf16>, vector<1x16x128xbf16> -> vector<1x16x384xbf16>
    %36 = vector.shape_cast %35 : vector<1x16x384xbf16> to vector<16x384xbf16>
    %c0_14 = arith.constant 0 : index
    %c0_15 = arith.constant 0 : index
    %37 = vector.load %arg6[%c0_14, %c0_15] : memref<384x128xbf16, #tpu.memory_space<vmem>>, vector<384x128xbf16>
    %cst_16 = arith.constant dense<0.000000e+00> : vector<16x128xf32>
    %38 = tpu.matmul %36, %37, %cst_16 {dimension_numbers = #tpu.dot_dimension_numbers<[1], [0], [0], [1], [0, 0, 1, 1], [], []>} : vector<16x384xbf16>, vector<384x128xbf16>, vector<16x128xf32> -> vector<16x128xf32>
    %39 = vector.shape_cast %38 : vector<16x128xf32> to vector<1x16x128xf32>
    %c0_17 = arith.constant 0 : index
    %c0_18 = arith.constant 0 : index
    %40 = vector.load %arg7[%c0_17, %c0_18] : memref<1x128xf32, #tpu.memory_space<vmem>>, vector<1x128xf32>
    %41 = vector.shape_cast %40 : vector<1x128xf32> to vector<1x1x128xf32>
    %42 = vector.broadcast %41 : vector<1x1x128xf32> to vector<1x16x128xf32>
    %43 = arith.addf %39, %42 : vector<1x16x128xf32>
    %cst_19 = arith.constant 0.000000e+00 : f32
    %44 = vector.broadcast %cst_19 : f32 to vector<1x16x128xf32>
    %45 = arith.maximumf %43, %44 : vector<1x16x128xf32>
    %46 = arith.truncf %45 : vector<1x16x128xf32> to vector<1x16x128xbf16>
    %c0_20 = arith.constant 0 : index
    %c0_21 = arith.constant 0 : index
    %c0_22 = arith.constant 0 : index
    %47 = vector.load %arg8[%c0_20, %c0_21, %c0_22] : memref<1x16x128xbf16, #tpu.memory_space<vmem>>, vector<1x16x128xbf16>
    tpu.vector_store %arg8[%c0_20, %c0_21, %c0_22], %46 {strides = array<i32>} : memref<1x16x128xbf16, #tpu.memory_space<vmem>>, vector<1x16x128xbf16>,
    return
  }
  func.func @transform_0(%arg0: i32) -> (i32, i32, i32) {
    %c0_i32 = arith.constant 0 : i32
    %c0_i32_0 = arith.constant 0 : i32
    %c0_i32_1 = arith.constant 0 : i32
    return %arg0, %c0_i32, %c0_i32_0 : i32, i32, i32
  }
  func.func @transform_1(%arg0: i32) -> (i32, i32) {
    %c0_i32 = arith.constant 0 : i32
    %c0_i32_0 = arith.constant 0 : i32
    %c0_i32_1 = arith.constant 0 : i32
    return %c0_i32, %c0_i32_0 : i32, i32
  }
  func.func @transform_2(%arg0: i32) -> (i32, i32) {
    %c0_i32 = arith.constant 0 : i32
    %c0_i32_0 = arith.constant 0 : i32
    %c0_i32_1 = arith.constant 0 : i32
    return %c0_i32, %c0_i32_0 : i32, i32
  }
  func.func @transform_3(%arg0: i32) -> (i32, i32) {
    %c0_i32 = arith.constant 0 : i32
    %c0_i32_0 = arith.constant 0 : i32
    %c0_i32_1 = arith.constant 0 : i32
    return %c0_i32, %c0_i32_0 : i32, i32
  }
  func.func @transform_4(%arg0: i32) -> (i32, i32) {
    %c0_i32 = arith.constant 0 : i32
    %c0_i32_0 = arith.constant 0 : i32
    %c0_i32_1 = arith.constant 0 : i32
    return %c0_i32, %c0_i32_0 : i32, i32
  }
  func.func @transform_5(%arg0: i32) -> (i32, i32) {
    %c0_i32 = arith.constant 0 : i32
    %c0_i32_0 = arith.constant 0 : i32
    %c0_i32_1 = arith.constant 0 : i32
    return %c0_i32, %c0_i32_0 : i32, i32
  }
  func.func @transform_6(%arg0: i32) -> (i32, i32) {
    %c0_i32 = arith.constant 0 : i32
    %c0_i32_0 = arith.constant 0 : i32
    %c0_i32_1 = arith.constant 0 : i32
    return %c0_i32, %c0_i32_0 : i32, i32
  }
  func.func @transform_7(%arg0: i32) -> (i32, i32, i32) {
    %c0_i32 = arith.constant 0 : i32
    %c0_i32_0 = arith.constant 0 : i32
    %c0_i32_1 = arith.constant 0 : i32
    return %arg0, %c0_i32, %c0_i32_0 : i32, i32, i32
  }
}

</mosaic_0001>

<bundles_post_ra>
// kernel: tpu_custom_call.1
= control target key start
LH: loop header
LB: loop body
LE: loop exit
PB: predicated region body
PF: predicated region fallthrough
CT: control target
= control target key end

     0   :  { %12 = vsyncpa [#allocation3], 0  ;;  %s1920_s0 = inlined_call_operand.hbm [shape: bf16[2,16,128], index: 0, kind: input, shape index: {}]   ;;  %s1921_s1 = inlined_call_operand.vmem [shape: f32[1,128], index: 1, kind: input, shape index: {}]   ;;  %s1922_s2 = inlined_call_operand.vmem [shape: f32[1,128], index: 2, kind: input, shape index: {}]   ;;  %s1923_s3 = inlined_call_operand.hbm [shape: bf16[384,128], index: 3, kind: input, shape index: {}]   ;;  %s1924_s4 = inlined_call_operand.vmem [shape: f32[1,128], index: 4, kind: input, shape index: {}]   ;;  %s1925_s5 = inlined_call_operand.hbm [shape: bf16[384,128], index: 5, kind: input, shape index: {}]   ;;  %s1926_s6 = inlined_call_operand.vmem [shape: f32[1,128], index: 6, kind: input, shape index: {}]   ;;  %s1927_s7 = inlined_call_operand.hbm [shape: bf16[2,16,128], index: 7, kind: output, shape index: {}]  }
   0x1   :  { %14 = vsyncpa [#allocation3 + $0x1], 0 }
   0x2   :  { %15 = vsyncpa [#allocation6], 0 }
   0x3   :  { %16 = vsyncpa [#allocation4], 0 }
   0x4   :  { %18 = vsyncpa [#allocation4 + $0x1], 0  ;;  %s1620_s24 = smov 0   ;;  %s1622_s25 = smov 0  }
   0x5   :  { %s1624_s26 = smov 0   ;;  %s1626_s27 = smov 0  }
   0x6 LB: > { %s1641_s28 = sadd.s32 4294967295, %s1568_s27   ;;  %s1104_s29 = sadd.s32 4294967294, %s1568_s27   ;;  %s1568_s27 = sphi %s1626_s27, %s1951_s27   ;;  %s1564_s26 = sphi %s1624_s26, %s1950_s26   ;;  %s1560_s25 = sphi %s1622_s25, %s1949_s25   ;;  %s1556_s24 = sphi %s1620_s24, %s1948_s24  }
   0x7   : > { %p44_p0 = scmp.ne.s32.totalorder %s1560_s25, %s1556_s24  ;;  %p1928_p1 = scmp.eq.s32.totalorder %s1641_s28, 0 }
   0x8   : > { %p200_p3 = scmp.eq.s32.totalorder %s1104_s29, 1  ;;  %p1105_p5 = scmp.ge.s32.totalorder %s1568_s27, 1 }
   0x9   : > { %p1650_p4 = por %p1928_p1, %p44_p0  ;;  %p207_p7 = scmp.lt.s32.totalorder %s1568_s27, 3 }
   0xa   : > { %p1655_p6 = por %p200_p3, %p44_p0  ;;  %s1570_s10 = smov [#allocation5]  }
   0xb   : > { %s1932_s30 = scalar_select %p1650_p4, 1, 0 }
   0xc   : > { %s1933_s8 = scalar_select %p1655_p6, 1, 0 }
   0xd   : > { %p1660_p8 = pnand %p1105_p5, %p207_p7  ;;  %s225_s11 = sshll.u32 %s1570_s10, 4  ;;  %s1664_s11 = int_to_ptr.vmem [resolvable:$true] %s225_s11 }
   0xe   : > { %s1571_s13 = smov [#allocation7]   ;;  %s1412_s17 = scalar_lea.hbm %s1923_s3, 3072 }
   0xf   : > { %p1303_p9 = pneg %p1660_p8  ;;  %s241_s14 = sshll.u32 %s1571_s13, 4  ;;  %s1675_s14 = int_to_ptr.vmem [resolvable:$true] %s241_s14 }
  0x10   : > { %p1413_p12 = scmp.ne.s32.totalorder %s1923_s3, %s1412_s17  ;;  %p1419_p5 = scmp.lt.u32.totalorder %s1412_s17, %s1923_s3 }
  0x11   : > { %p1671_p11 = pnand %p1303_p9, %p1928_p1 }
  0x13   : > { %p1414_p13 = pneg %p1671_p11 }
  0x15   : > { %p1415_p0 = pnand %p1414_p13, %p1413_p12 }
  0x17   : > { %p1416_p3 = pneg %p1415_p0 }
  0x19   : > { %p1421_p7 = pnand %p1419_p5, %p1416_p3 }
  0x1b   : > { %1424 = shalt.err (!%p1421_p7)
}
  0x1c   : > { %s1425_s22 = scalar_lea.vmem %s1664_s11, 3072  ;;  %p1433_p2 = scmp.lt.s32.totalorder %s1664_s11, %s1664_s11 }
  0x1d   : > { %p1426_p9 = scmp.ne.s32.totalorder %s1664_s11, %s1425_s22  ;;  %p1434_p12 = scmp.lt.s32.totalorder %s1425_s22, %s1425_s22 }
  0x1f   : > { %p1428_p10 = pnand %p1426_p9, %p1414_p13  ;;  %p1435_p0 = por %p1434_p12, %p1433_p2 }
  0x21   : > { %p1429_p1 = pneg %p1428_p10 }
  0x23   : > { %p1436_p6 = pnand %p1435_p0, %p1429_p1 }
  0x25   : > { %1439 = shalt.err (!%p1436_p6)
}
  0x26   : > { %s1929_s23 = smov 64   ;;  %s1573_s29 = smov 4  }
  0x27   : > { %1306 = dma.hbm_to_vmem [thread:$0]  (!%p1671_p11), %s1923_s3, 3072, %s1664_s11, [#allocation6], %s1929_s23, %s1929_s23, %s1573_s29  }
  0x28   : > { %s1440_s17 = scalar_lea.hbm %s1925_s5, 3072 }
  0x29   : > { %p1441_p1 = scmp.ne.s32.totalorder %s1925_s5, %s1440_s17  ;;  %p1447_p10 = scmp.lt.u32.totalorder %s1440_s17, %s1925_s5 }
  0x2b   : > { %p1443_p2 = pnand %p1441_p1, %p1414_p13 }
  0x2d   : > { %p1444_p6 = pneg %p1443_p2 }
  0x2f   : > { %p1449_p3 = pnand %p1447_p10, %p1444_p6 }
  0x31   : > { %1452 = shalt.err (!%p1449_p3)
}
  0x32   : > { %s1453_s11 = scalar_lea.vmem %s1675_s14, 3072  ;;  %p1461_p12 = scmp.lt.s32.totalorder %s1675_s14, %s1675_s14 }
  0x33   : > { %p1454_p5 = scmp.ne.s32.totalorder %s1675_s14, %s1453_s11  ;;  %p1462_p0 = scmp.lt.s32.totalorder %s1453_s11, %s1453_s11 }
  0x35   : > { %p1456_p7 = pnand %p1454_p5, %p1414_p13  ;;  %p1463_p1 = por %p1462_p0, %p1461_p12 }
  0x37   : > { %p1457_p9 = pneg %p1456_p7 }
  0x39   : > { %p1464_p2 = pnand %p1463_p1, %p1457_p9 }
  0x3b   : > { %1467 = shalt.err (!%p1464_p2)
}
  0x3c   : > { %1309 = dma.hbm_to_vmem [thread:$0]  (!%p1671_p11), %s1925_s5, 3072, %s1675_s14, [#allocation6], %s1929_s23, %s1929_s23, %s1573_s29  }
  0x3d   : > { %s1736_s12 = sadd.s32 1, %s1568_s27   ;;  %s31_s13 = sadd.s32 1, %s1564_s26 }
  0x3e   : > { %s28_s15 = ssub.s32 %s1568_s27, %s1736_s12  ;;  %p38_p13 = scmp.ne.s32.totalorder %s1564_s26, %s1560_s25 }
  0x3f   : > { %p29_p6 = scmp.eq.s32.totalorder %s28_s15, 0  ;;  %p39_p10 = scmp.eq.s32.totalorder %s1568_s27, 0 }
  0x40   : > { %p1936_p3 = scmp.eq.s32.totalorder %s1641_s28, 1  ;;  %p1320_p7 = scmp.lt.s32.totalorder %s1568_s27, 2 }
  0x41   : > { %s1752_s17 = scalar_select %p29_p6, %s1564_s26, %s31_s13  }
  0x42   : > { %p1746_p5 = por %p1936_p3, %p38_p13  ;;  %p40_p9 = por %p39_p10, %p38_p13 }
  0x43   : > { %s258_s18 = sand.u32 1, %s1564_s26   ;;  %s1176_s14 = sshll.u32 %s1568_s27, 7 }
  0x44   : > { %s1937_s16 = scalar_select %p1746_p5, 1, 0 }
  0x45   : > { %s1109_s19 = sshll.u32 %s258_s18, 3  ;;  %s1759_s11 = scalar_lea.hbm %s1920_s0, %s1176_s14 }
  0x46   : > { %s262_s22 = scalar_lea.vmem [#allocation2], %s1109_s19  ;;  %p1763_p11 = pnand %p1320_p7, %p40_p9 }
  0x47   : > { %s269_s10 = sshll.u32 %s262_s22, 4  ;;  %s1767_s15 = scalar_lea.sflag [#allocation3], %s258_s18  ;;  %s1761_s10 = int_to_ptr.vmem [resolvable:$true] %s269_s10 }
  0x48   : > { %s1468_s23 = scalar_lea.hbm %s1759_s11, 128  ;;  %p1470_p0 = pneg %p1763_p11 }
  0x49   : > { %p1469_p12 = scmp.ne.s32.totalorder %s1759_s11, %s1468_s23  ;;  %s1473_s20 = scalar_lea.hbm %s1920_s0, 256 }
  0x4a   : > { %p1474_p13 = scmp.lt.u32.totalorder %s1759_s11, %s1920_s0  ;;  %p1475_p6 = scmp.lt.u32.totalorder %s1473_s20, %s1468_s23 }
  0x4b   : > { %p1471_p1 = pnand %p1470_p0, %p1469_p12  ;;  %p1477_p3 = scmp.lt.u32.totalorder %s1468_s23, %s1759_s11 }
  0x4c   : > { %p1476_p10 = por %p1475_p6, %p1474_p13 }
  0x4d   : > { %p1472_p2 = pneg %p1471_p1 }
  0x4e   : > { %p1478_p7 = por %p1477_p3, %p1476_p10 }
  0x50   : > { %p1479_p9 = pnand %p1478_p7, %p1472_p2 }
  0x52   : > { %1482 = shalt.err (!%p1479_p9)
}
  0x53   : > { %s1483_s18 = scalar_lea.vmem %s1761_s10, 128  ;;  %s1574_s19 = smov [#allocation2]  }
  0x54   : > { %p1484_p12 = scmp.ne.s32.totalorder %s1761_s10, %s1483_s18  ;;  %s1488_s14 = sshll.u32 %s1574_s19, 4  ;;  %s1489_s14 = int_to_ptr.vmem [resolvable:$false] %s1488_s14 }
  0x55   : > { %s1490_s21 = scalar_lea.vmem %s1489_s14, 256  ;;  %p1491_p4 = scmp.lt.s32.totalorder %s1761_s10, %s1489_s14 }
  0x56   : > { %p1486_p1 = pnand %p1484_p12, %p1470_p0  ;;  %p1492_p13 = scmp.lt.s32.totalorder %s1490_s21, %s1483_s18 }
  0x58   : > { %p1487_p5 = pneg %p1486_p1  ;;  %p1493_p6 = por %p1492_p13, %p1491_p4 }
  0x5a   : > { %p1494_p10 = pnand %p1493_p6, %p1487_p5 }
  0x5c   : > { %1497 = shalt.err (!%p1494_p10)
}
  0x5d   : > { %s1939_s23 = smov 64   ;;  %281 = sbr.rel (%p1660_p8) target bundleno = 620 (0x26c), region = 48 }
  0x5e   : > { %1313 = dma.hbm_to_vmem [thread:$0]  (!%p1763_p11), %s1759_s11, 128, %s1761_s10, %s1767_s15, %s1939_s23, %s1939_s23, %s1573_s29  }
  0x5f   : > { %s1801_s20 = sand.u32 (!%p1660_p8), 1, %s1560_s25   ;;  %p1940_p4 = scmp.ne.s32.totalorder (!%p1660_p8), %s1932_s30, 0 }
  0x60   : > { %s1113_s22 = sshll.u32 (!%p1660_p8), %s1801_s20, 3  ;;  %s284_s18 = scalar_lea.sflag (!%p1660_p8), [#allocation3], %s1801_s20 }
  0x61   : > { %s1807_s13 = scalar_lea.vmem (!%p1660_p8), [#allocation2], %s1113_s22 }
  0x64   : > { %1543 = dma.done.wait (%p1940_p4), %s284_s18, 128  }
  0x65   : > { %1545 = vsyncadd (%p1940_p4), %s284_s18, 4294967168  ;;  %p1941_p5 = scmp.eq.s32.totalorder %s1641_s28, 0 }
  0x67   : > { %1547 = dma.done.wait (%p1941_p5), [#allocation6], 6144   ;;  %p1942_p8 = pmov %p1941_p5 }
  0x68   : > { %v1575_v0 = vmov 0.0   ;;  %vm1576_vm0 = vmmov 0   ;;  %v1364_v1 = vld [vmem:[#allocation5 + $0x40] sm:$0xff]   ;;  %v1367_v4 = vld [vmem:[#allocation5 + $0x48] sm:$0xff]   ;;  %v1370_v7 = vld [vmem:[#allocation5 + $0x50] sm:$0xff]   ;;  %vm361_vm2 = vcmask 1040384  }
  0x69   : > { %1549 = vsyncadd (%p1942_p8), [#allocation6], 4294961152  ;;  %1251 = vmatprep.subr.bf16.mxu1 %v1575_v0  ;;  %1267 = vmatprep.mubr.msk.bf16.mxu1 %vm1576_vm0, %v1575_v0  ;;  %v1365_v2 = vld [vmem:[#allocation5] sm:$0xff]   ;;  %v1368_v5 = vld [vmem:[#allocation5 + $0x8] sm:$0xff]   ;;  %vm362_vm1 = vsmask.f32 256 }
  0x6a   : > { %1189 = vmatprep.subr.bf16.mxu0 %v1364_v1  ;;  %v1366_v3 = vld [vmem:[#allocation5 + $0x80] sm:$0xff]   ;;  %v1369_v6 = vld [vmem:[#allocation5 + $0x88] sm:$0xff]   ;;  %v1371_v8 = vld [vmem:[#allocation5 + $0x10] sm:$0xff]   ;;  %vm382_vm4 = vcmask 1046528   ;;  %vm366_vm5 = vsmask.f32 7424 }
  0x6b   : > { %1190 = vmatpush3.bf16.msra.mxu0 %v1365_v2  ;;  %1252 = vmatpush3.bf16.msra.mxu1 %v1366_v3  ;;  %v1372_v9 = vld [vmem:[#allocation5 + $0x90] sm:$0xff]   ;;  %v1373_v10 = vld [vmem:[#allocation5 + $0x58] sm:$0xff]   ;;  %v1376_v13 = vld [vmem:[#allocation5 + $0x60] sm:$0xff]   ;;  %s1179_s21 = sshll.u32 %s1641_s28, 7  ;;  %s325_s23 = scalar_lea.vmem [#allocation8], %s1113_s22 }
  0x6c   : > { %1191 = vmatprep.subr.bf16.mxu0 %v1367_v4  ;;  %1253 = vmatprep.subr.bf16.mxu1 %v1575_v0  ;;  %v1374_v11 = vld [vmem:[#allocation5 + $0x18] sm:$0xff]   ;;  %v1377_v14 = vld [vmem:[#allocation5 + $0x20] sm:$0xff]   ;;  %v1379_v16 = vld [vmem:[#allocation5 + $0x68] sm:$0xff]   ;;  %s1012_s18 = sshll.u32 %s325_s23, 4  ;;  %s1874_s9 = scalar_lea.hbm %s1927_s7, %s1179_s21  ;;  %s1876_s18 = int_to_ptr.vmem [resolvable:$true] %s1012_s18 }
  0x6d   : > { %v1375_v12 = vld [vmem:[#allocation5 + $0x98] sm:$0xff]   ;;  %v1378_v15 = vld [vmem:[#allocation5 + $0xa0] sm:$0xff]   ;;  %v1380_v17 = vld [vmem:[#allocation5 + $0x28] sm:$0xff]   ;;  %s999_s29 = scalar_lea.sflag [#allocation4], %s1801_s20  ;;  %s1498_s11 = scalar_lea.vmem %s1876_s18, 128 }
  0x6e   : > { %v1381_v18 = vld [vmem:[#allocation5 + $0xa8] sm:$0xff]   ;;  %v1382_v19 = vld [vmem:[#allocation5 + $0x70] sm:$0xff]   ;;  %v1385_v22 = vld [vmem:[#allocation5 + $0x78] sm:$0xff]   ;;  %p1499_p11 = scmp.ne.s32.totalorder %s1876_s18, %s1498_s11  ;;  %p1945_p0 = scmp.ne.s32.totalorder %s1937_s16, 0 }
  0x6f   : > { %1192 = vmatpush3.bf16.msra.mxu0 %v1368_v5  ;;  %1254 = vmatpush3.bf16.msra.mxu1 %v1369_v6  ;;  %v1383_v20 = vld [vmem:[#allocation5 + $0x30] sm:$0xff]   ;;  %v1386_v25 = vld [vmem:[#allocation5 + $0x38] sm:$0xff]   ;;  %v1389_v32 = vld [vmem:[#allocation7 + $0x40] sm:$0xff]   ;;  %s1577_s28 = smov [#allocation8]  }
  0x70   : > { %1193 = vmatprep.subr.bf16.mxu0 %v1370_v7  ;;  %1255 = vmatprep.subr.bf16.mxu1 %v1575_v0  ;;  %v1384_v21 = vld [vmem:[#allocation5 + $0xb0] sm:$0xff]   ;;  %v1387_v29 = vld [vmem:[#allocation5 + $0xb8] sm:$0xff]   ;;  %vm1837_vm3 = vmand %vm361_vm2, %vm362_vm1  ;;  %p1500_p2 = pnand %p1499_p11, %p1945_p0  ;;  %s1502_s22 = sshll.u32 %s1577_s28, 4  ;;  %s1503_s22 = int_to_ptr.vmem [resolvable:$false] %s1502_s22 }
  0x71   : > { %v1181_v23 = vld [vmem:[%s1807_s13] sm:$0xff]   ;;  %v1388_v50 = vld [vmem:[#allocation7 + $0x80] sm:$0xff]   ;;  %v1390_v55 = vld [vmem:[#allocation7 + $0x88] sm:$0xff]   ;;  %s1504_s10 = scalar_lea.vmem %s1503_s22, 256  ;;  %p1505_p7 = scmp.lt.s32.totalorder %s1876_s18, %s1503_s22 }
  0x72   : > { %v1117_v24 = vld [vmem:[%s1921_s1] ss:$0 sm:$0xff]  ;;  %v1182_v26 = vunpack.c.l.bf16 %v1181_v23  ;;  %v1183_v27 = vunpack.c.h.bf16 %v1181_v23  ;;  %v1391_v56 = vld [vmem:[#allocation7] sm:$0xff]   ;;  %v1392_v58 = vld [vmem:[#allocation7 + $0x48] sm:$0xff]   ;;  %p1501_p3 = pneg %p1500_p2  ;;  %p1506_p9 = scmp.lt.s32.totalorder %s1504_s10, %s1498_s11 }
  0x73   : > { %1194 = vmatpush3.bf16.msra.mxu0 %v1371_v8  ;;  %1256 = vmatpush3.bf16.msra.mxu1 %v1372_v9  ;;  %v1118_v28 = vld [vmem:[%s1922_s2] ss:$0 sm:$0xff]  ;;  %v1394_v60 = vld [vmem:[#allocation7 + $0x8] sm:$0xff]   ;;  %v1396_v62 = vld [vmem:[#allocation7 + $0x98] sm:$0xff]  }
  0x74   : > { %1195 = vmatprep.subr.bf16.mxu0 %v1373_v10  ;;  %1257 = vmatprep.subr.bf16.mxu1 %v1575_v0  ;;  %v338_v30 = vmul.f32 %v1182_v26, %v1117_v24  ;;  %v339_v31 = vmul.f32 %v1183_v27, %v1117_v24  ;;  %v1393_v59 = vld [vmem:[#allocation7 + $0x90] sm:$0xff]   ;;  %v1398_v1 = vld [vmem:[#allocation7 + $0x58] sm:$0xff]   ;;  %v1399_v2 = vld [vmem:[#allocation7 + $0xa0] sm:$0xff]   ;;  %p1507_p12 = por %p1506_p9, %p1505_p7 }
  0x75   : > { %v1395_v61 = vld [vmem:[#allocation7 + $0x50] sm:$0xff]   ;;  %v1400_v3 = vld [vmem:[#allocation7 + $0x18] sm:$0xff]   ;;  %v1401_v4 = vld [vmem:[#allocation7 + $0x60] sm:$0xff]  }
  0x76   : > { %v347_v33 = vadd.f32 %v1118_v28, %v338_v30  ;;  %v348_v34 = vadd.f32 %v1118_v28, %v339_v31  ;;  %v1397_v63 = vld [vmem:[#allocation7 + $0x10] sm:$0xff]   ;;  %v1402_v5 = vld [vmem:[#allocation7 + $0xa8] sm:$0xff]   ;;  %v1403_v6 = vld [vmem:[#allocation7 + $0x20] sm:$0xff]   ;;  %p1508_p1 = pnand %p1507_p12, %p1501_p3 }
  0x77   : > { %1196 = vmatpush3.bf16.msra.mxu0 %v1374_v11  ;;  %1258 = vmatpush3.bf16.msra.mxu1 %v1375_v12  ;;  %v1404_v7 = vld [vmem:[#allocation7 + $0x68] sm:$0xff]   ;;  %v1405_v8 = vld [vmem:[#allocation7 + $0xb0] sm:$0xff]   ;;  %v1408_v11 = vld [vmem:[#allocation7 + $0xb8] sm:$0xff]  }
  0x78   : > { %1197 = vmatprep.subr.bf16.mxu0 %v1376_v13  ;;  %1259 = vmatprep.subr.bf16.mxu1 %v1575_v0  ;;  %v349_v35 = vmax.f32 %v347_v33, 0.0  ;;  %v350_v36 = vmax.f32 %v348_v34, 0.0  ;;  %v1406_v9 = vld [vmem:[#allocation7 + $0x28] sm:$0xff]   ;;  %v1407_v10 = vld [vmem:[#allocation7 + $0x70] sm:$0xff]   ;;  %v1410_v13 = vld [vmem:[#allocation7 + $0x78] sm:$0xff]  }
  0x79   : > { %v1409_v12 = vld [vmem:[#allocation7 + $0x30] sm:$0xff]  }
  0x7a   : > { %v351_v37 = vpack.c.bf16 %v350_v36, %v349_v35 }
  0x7b   : > { %1198 = vmatpush3.bf16.msra.mxu0 %v1377_v14  ;;  %1260 = vmatpush3.bf16.msra.mxu1 %v1378_v15  ;;  %v1411_v14 = vld [vmem:[#allocation7 + $0x38] sm:$0xff]  }
  0x7c   : > { %1199 = vmatprep.subr.bf16.mxu0 %v1379_v16  ;;  %1261 = vmatprep.subr.bf16.mxu1 %v1575_v0  ;;  %v353_v38 = vshrl.u32 %v351_v37, 16  ;;  %v356_v39 = vshll.u32 %v351_v37, 16 }
  0x7e   : > { %v355_v40 = vrot.slane %v353_v38, 7 }
  0x7f   : > { %1200 = vmatpush3.bf16.msra.mxu0 %v1380_v17  ;;  %1262 = vmatpush3.bf16.msra.mxu1 %v1381_v18 }
  0x80   : > { %1201 = vmatprep.subr.bf16.mxu0 %v1382_v19  ;;  %1263 = vmatprep.subr.bf16.mxu1 %v1575_v0  ;;  %v358_v42 = vor.u32 %v356_v39, %v355_v40  ;;  %v365_v43 = vsel %vm1837_vm3, %v355_v40, 0 }
  0x81   : > { %v375_v44 = vshll.u32 %v365_v43, 16  ;;  %v384_v45 = vrot.slane %v365_v43, 1 }
  0x82   : > { %v364_v46 = vsel %vm1837_vm3, 0, %v358_v42 }
  0x83   : > { %1202 = vmatpush3.bf16.msra.mxu0 %v1383_v20  ;;  %1264 = vmatpush3.bf16.msra.mxu1 %v1384_v21  ;;  %v368_v47 = vshrl.u32 %v364_v46, 16  ;;  %v370_v48 = vshll.u32 %v364_v46, 16  ;;  %v383_v49 = vrot.slane %v364_v46, 1  ;;  %v377_v52 = vrot.slane %v375_v44, 1 }
  0x84   : > { %1203 = vmatprep.subr.bf16.mxu0 %v1385_v22  ;;  %1265 = vmatprep.subr.bf16.mxu1 %v1575_v0 }
  0x85   : > { %v372_v51 = vrot.slane %v370_v48, 1  ;;  %v385_v53 = vsel %vm382_vm4, %v383_v49, %v384_v45 }
  0x87   : > { %1204 = vmatpush3.bf16.msra.mxu0 %v1386_v25  ;;  %1266 = vmatpush3.bf16.msra.mxu1 %v1387_v29  ;;  %v373_v54 = vor.u32 %v372_v51, %v368_v47 }
  0x88   : > { %1220 = vmatprep.subr.bf16.mxu0 %v1389_v32  ;;  %1271 = vmatprep.subr.bf16.mxu1 %v1575_v0 }
  0x89   : > { %v378_v57 = vsel %vm366_vm5, %v373_v54, %v377_v52 }
  0x8a   : > { %1268 = vmatmul.mubr.bf16.vlgmr.msra.gmra.mrb[0].mxu1 %v385_v53  ;;  %611 = vmatprep.mubr.bf16.mxu0 %v378_v57 }
  0x8b   : > { %1272 = vmatpush3.bf16.msra.mxu1 %v1388_v50  ;;  %1287 = vmatprep.mubr.msk.bf16.mxu1 %vm1576_vm0, %v1575_v0 }
  0x8c   : > { %1273 = vmatprep.subr.bf16.mxu1 %v1575_v0  ;;  %612 = vmatmul.mubr.bf16.vlgmr.msra.gmra.mrb[0].mxu0 %v364_v46 }
  0x8d   : > { %1221 = vmatpush3.bf16.msra.mxu0 %v1391_v56  ;;  %v1168_v56 = vld [vmem:[%s1926_s6] ss:$0 sm:$0xff] }
  0x8e   : > { %1222 = vmatprep.subr.bf16.mxu0 %v1392_v58 }
  0x8f   : > { %1274 = vmatpush3.bf16.msra.mxu1 %v1390_v55 }
  0x90   : > { %1275 = vmatprep.subr.bf16.mxu1 %v1575_v0 }
  0x91   : > { %1223 = vmatpush3.bf16.msra.mxu0 %v1394_v60 }
  0x92   : > { %1224 = vmatprep.subr.bf16.mxu0 %v1395_v61 }
  0x93   : > { %1276 = vmatpush3.bf16.msra.mxu1 %v1393_v59 }
  0x94   : > { %1277 = vmatprep.subr.bf16.mxu1 %v1575_v0 }
  0x95   : > { %1225 = vmatpush3.bf16.msra.mxu0 %v1397_v63 }
  0x96   : > { %1226 = vmatprep.subr.bf16.mxu0 %v1398_v1 }
  0x97   : > { %1278 = vmatpush3.bf16.msra.mxu1 %v1396_v62 }
  0x98   : > { %1279 = vmatprep.subr.bf16.mxu1 %v1575_v0 }
  0x99   : > { %1227 = vmatpush3.bf16.msra.mxu0 %v1400_v3 }
  0x9a   : > { %1228 = vmatprep.subr.bf16.mxu0 %v1401_v4 }
  0x9b   : > { %1280 = vmatpush3.bf16.msra.mxu1 %v1399_v2 }
  0x9c   : > { %1281 = vmatprep.subr.bf16.mxu1 %v1575_v0 }
  0x9d   : > { %1229 = vmatpush3.bf16.msra.mxu0 %v1403_v6 }
  0x9e   : > { %1230 = vmatprep.subr.bf16.mxu0 %v1404_v7 }
  0x9f   : > { %1282 = vmatpush3.bf16.msra.mxu1 %v1402_v5 }
  0xa0   : > { %1283 = vmatprep.subr.bf16.mxu1 %v1575_v0 }
  0xa1   : > { %1231 = vmatpush3.bf16.msra.mxu0 %v1406_v9 }
  0xa2   : > { %1232 = vmatprep.subr.bf16.mxu0 %v1407_v10 }
  0xa3   : > { %1284 = vmatpush3.bf16.msra.mxu1 %v1405_v8 }
  0xa4   : > { %1285 = vmatprep.subr.bf16.mxu1 %v1575_v0  ;;  %v1143_v0 = vld [vmem:[%s1924_s4] ss:$0 sm:$0xff] }
  0xa5   : > { %1233 = vmatpush3.bf16.msra.mxu0 %v1409_v12 }
  0xa6   : > { %1234 = vmatprep.subr.bf16.mxu0 %v1410_v13 }
  0xa7   : > { %1286 = vmatpush3.bf16.msra.mxu1 %v1408_v11 }
  0xa9   : > { %1235 = vmatpush3.bf16.msra.mxu0 %v1411_v14 }
 0x15d   : > { %v654_v15 = vpop.f32.mrb[0].mxu1 }
 0x15e   : > { %v1269_v16 = vpop.f32.mrb[1].mxu1 }
 0x15f   : > { %v657_v17 = vpop.f32.mrb[2].mxu1  ;;  %v1205_v19 = vpop.f32.mrb[0].mxu0 }
 0x160   : > { %v1270_v18 = vpop.f32.mrb[3].mxu1  ;;  %v1206_v20 = vpop.f32.mrb[1].mxu0 }
 0x161   : > { %v1207_v21 = vadd.f32 %v1206_v20, %v1205_v19  ;;  %v1208_v22 = vpop.f32.mrb[2].mxu0 }
 0x162   : > { %v1209_v23 = vpop.f32.mrb[3].mxu0 }
 0x163   : > { %v655_v24 = vadd.f32 %v1207_v21, %v654_v15  ;;  %v1210_v25 = vadd.f32 %v1209_v23, %v1208_v22 }
 0x165   : > { %v668_v26 = vadd.f32 %v1143_v0, %v655_v24  ;;  %v658_v27 = vadd.f32 %v1210_v25, %v657_v17 }
 0x167   : > { %v669_v28 = vadd.f32 %v1143_v0, %v658_v27  ;;  %v670_v29 = vmax.f32 %v668_v26, 0.0 }
 0x169   : > { %v671_v30 = vmax.f32 %v669_v28, 0.0 }
 0x16b   : > { %v672_v31 = vpack.c.bf16 %v671_v30, %v670_v29 }
 0x16d   : > { %v674_v32 = vshrl.u32 %v672_v31, 16  ;;  %v677_v34 = vshll.u32 %v672_v31, 16 }
 0x16f   : > { %v676_v33 = vrot.slane %v674_v32, 7 }
 0x171   : > { %v679_v35 = vor.u32 %v677_v34, %v676_v33  ;;  %v683_v36 = vsel %vm1837_vm3, %v676_v33, 0 }
 0x172   : > { %v700_v39 = vrot.slane %v683_v36, 1  ;;  %v692_v42 = vshll.u32 %v683_v36, 16 }
 0x173   : > { %v682_v37 = vsel %vm1837_vm3, 0, %v679_v35 }
 0x174   : > { %v699_v38 = vrot.slane %v682_v37, 1  ;;  %v687_v40 = vshll.u32 %v682_v37, 16  ;;  %v685_v44 = vshrl.u32 %v682_v37, 16  ;;  %v694_v47 = vrot.slane %v692_v42, 1 }
 0x176   : > { %v701_v43 = vsel %vm382_vm4, %v699_v38, %v700_v39  ;;  %v689_v45 = vrot.slane %v687_v40, 1 }
 0x177   : > { %1288 = vmatmul.mubr.bf16.vlgmr.msra.gmra.mrb[4].mxu1 %v701_v43 }
 0x178   : > { %v690_v46 = vor.u32 %v689_v45, %v685_v44 }
 0x17a   : > { %v695_v48 = vsel %vm366_vm5, %v690_v46, %v694_v47 }
 0x17b   : > { %927 = vmatprep.mubr.bf16.mxu0 %v695_v48 }
 0x17c   : > { %928 = vmatmul.mubr.bf16.vlgmr.msra.gmra.mrb[4].mxu0 %v682_v37 }
 0x24a   : > { %v970_v49 = vpop.f32.mrb[4].mxu1 }
 0x24b   : > { %v1289_v41 = vpop.f32.mrb[5].mxu1 }
 0x24c   : > { %v973_v50 = vpop.f32.mrb[6].mxu1 }
 0x24d   : > { %v1290_v51 = vpop.f32.mrb[7].mxu1 }
 0x24f   : > { %v1236_v52 = vpop.f32.mrb[4].mxu0 }
 0x250   : > { %v1237_v53 = vpop.f32.mrb[5].mxu0 }
 0x251   : > { %v1238_v54 = vadd.f32 %v1237_v53, %v1236_v52  ;;  %v1239_v55 = vpop.f32.mrb[6].mxu0 }
 0x252   : > { %v1240_v57 = vpop.f32.mrb[7].mxu0 }
 0x253   : > { %v971_v58 = vadd.f32 %v1238_v54, %v970_v49  ;;  %v1241_v59 = vadd.f32 %v1240_v57, %v1239_v55 }
 0x255   : > { %v984_v60 = vadd.f32 %v1168_v56, %v971_v58  ;;  %v974_v61 = vadd.f32 %v1241_v59, %v973_v50 }
 0x257   : > { %v985_v62 = vadd.f32 %v1168_v56, %v974_v61  ;;  %v986_v63 = vmax.f32 %v984_v60, 0.0 }
 0x259   : > { %v987_v1 = vmax.f32 %v985_v62, 0.0 }
 0x25b   : > { %v1187_v2 = vpack.c.bf16 %v987_v1, %v986_v63 }
 0x25d   : > { %1188 = vst [vmem:[%s325_s23] sm:$0xff] %v1187_v2  }
 0x25e   : > { %1511 = shalt.err (!%p1508_p1)
}
 0x25f   : > { %s1512_s15 = scalar_lea.hbm %s1874_s9, 128  ;;  %s1516_s21 = scalar_lea.hbm %s1927_s7, 256 }
 0x260   : > { %p1513_p13 = scmp.ne.s32.totalorder %s1874_s9, %s1512_s15  ;;  %p1517_p4 = scmp.lt.u32.totalorder %s1874_s9, %s1927_s7 }
 0x261   : > { %p1518_p5 = scmp.lt.u32.totalorder %s1516_s21, %s1512_s15  ;;  %p1520_p11 = scmp.lt.u32.totalorder %s1512_s15, %s1874_s9 }
 0x262   : > { %p1514_p6 = pnand %p1513_p13, %p1945_p0 }
 0x263   : > { %p1519_p8 = por %p1518_p5, %p1517_p4 }
 0x264   : > { %p1515_p10 = pneg %p1514_p6 }
 0x265   : > { %p1521_p2 = por %p1520_p11, %p1519_p8 }
 0x267   : > { %p1522_p3 = pnand %p1521_p2, %p1515_p10 }
 0x269   : > { %1525 = shalt.err (!%p1522_p3)
}
 0x26a   : > { %s1578_s30 = smov 64   ;;  %s1579_s11 = smov 4  }
 0x26b   : > { %1301 = dma.vmem_to_hbm [thread:$0]  (%p1945_p0), %s1876_s18, 128, %s1874_s9, %s999_s29, %s1578_s30, %s1578_s30, %s1579_s11  }
 0x26c PF: > { %s1027_s28 = sand.u32 1, %s1556_s24   ;;  %p1946_p7 = scmp.ne.s32.totalorder %s1933_s8, 0 }
 0x26d   : > { %p1947_p9 = scmp.ge.s32.totalorder %s1568_s27, 2  ;;  %s1028_s22 = scalar_lea.sflag [#allocation4], %s1027_s28 }
 0x26f   : > { %p1315_p12 = pnand %p1947_p9, %p1946_p7 }
 0x271   : > { %1551 = dma.done.wait (!%p1315_p12), %s1028_s22, 128  }
 0x272   : > { %1553 = vsyncadd (!%p1315_p12), %s1028_s22, 4294967168  ;;  %p21_p1 = scmp.ge.s32.totalorder %s1736_s12, 4   ;;  %s1948_s24 = smov %s1560_s25 }
 0x273   : > { %s1949_s25 = smov %s1564_s26  ;;  %s1950_s26 = smov %s1752_s17 }
 0x274   : > { %s1951_s27 = smov %s1736_s12  ;;  %23 = sbr.rel (!%p21_p1) target bundleno = 6 (0x6), region = 101 }
 0x27b   :  { %1033 = vsyncpa [#allocation3], 1 }
 0x27c   :  { %1035 = vsyncpa [#allocation3 + $0x1], 1 }
 0x27d   :  { %1036 = vsyncpa [#allocation6], 1 }
 0x27e   :  { %1037 = vsyncpa [#allocation4], 1 }
 0x27f   :  { %1039 = vsyncpa [#allocation4 + $0x1], 1 }

</bundles_post_ra>
